<compile_context>
chip_gen: v7x
topology: tpu7x:2x2x1
jax: 0.10.0
libtpu: 0.0.40
codegen_flags: <defaults>
</compile_context>

<pallas_src>
import jax
import jax.numpy as jnp
from jax.experimental import pallas as pl
from jax.experimental.pallas import tpu as pltpu


def _make_loss_kernel(label_smoothing: float, t_tile: int, t_real: int):
    ls = float(label_smoothing)

    def kernel(act_s_ref, st_s_ref, en_s_ref,
               act_m_ref, st_m_ref, en_m_ref,
               cw_ref, bw_ref, out_ref):
        def bce_with_logits(x, z):
            # numerically stable: max(x,0) - x*z + log(1 + exp(-|x|))
            return (jnp.maximum(x, 0.0) - x * z
                    + jnp.log(1.0 + jnp.exp(-jnp.abs(x))))

        # blocks are (1, C, T_TILE); cast to f32 once data is in VMEM
        act_s = act_s_ref[...].astype(jnp.float32)
        st_s = st_s_ref[...].astype(jnp.float32)
        en_s = en_s_ref[...].astype(jnp.float32)
        act_m = act_m_ref[...].astype(jnp.float32)
        st_m = st_m_ref[...].astype(jnp.float32)
        en_m = en_m_ref[...].astype(jnp.float32)

        if ls > 0.0:
            act_m = act_m * (1.0 - ls) + 0.5 * ls
            st_m = st_m * (1.0 - ls) + 0.5 * ls
            en_m = en_m * (1.0 - ls) + 0.5 * ls

        cw = cw_ref[...]   # (1, C, 1) -> lane broadcast
        bw = bw_ref[...]   # (1, C, 1)

        # frame-validity mask over the lane (time) axis: handles T padding.
        t0 = pl.program_id(1) * t_tile
        pos = jax.lax.broadcasted_iota(jnp.int32, (1, 1, t_tile), 2) + t0
        frame_ok = (pos < t_real).astype(jnp.float32)          # (1, 1, TT)

        a_loss = bce_with_logits(act_s, act_m) * cw             # (1, C, TT)
        s_loss = bce_with_logits(st_s, st_m) * bw               # (1, C, TT)
        e_loss = bce_with_logits(en_s, en_m) * bw               # (1, C, TT)

        # valid regions: frames where (smoothed) action mask has any mass.
        # Sum over C is a cheap sublane reduction in this layout.
        valid = (jnp.sum(act_m, axis=1, keepdims=True) > 0.0)
        valid = valid.astype(jnp.float32) * frame_ok             # (1, 1, TT)

        a_sum = jnp.sum(a_loss * frame_ok)
        sv_sum = jnp.sum(s_loss * valid)
        ev_sum = jnp.sum(e_loss * valid)
        s_sum = jnp.sum(s_loss * frame_ok)
        e_sum = jnp.sum(e_loss * frame_ok)
        v_sum = jnp.sum(valid)

        # pack the six partial sums into one (1, 1, 8) lane vector
        lane = jax.lax.broadcasted_iota(jnp.int32, (1, 1, 8), 2)
        out_ref[...] = (jnp.where(lane == 0, a_sum, 0.0)
                        + jnp.where(lane == 1, sv_sum, 0.0)
                        + jnp.where(lane == 2, ev_sum, 0.0)
                        + jnp.where(lane == 3, s_sum, 0.0)
                        + jnp.where(lane == 4, e_sum, 0.0)
                        + jnp.where(lane == 5, v_sum, 0.0))

    return kernel


def action_detection_loss(predictions, targets, *,
                          action_weight, start_weight, end_weight,
                          class_weights, boundary_weights,
                          label_smoothing=0.1, t_tile=2048):
    action_scores = predictions['action_scores']   # (B, T, C)
    start_scores = predictions['start_scores']     # (B, T, C)
    end_scores = predictions['end_scores']         # (B, T, C)
    action_masks = targets['action_masks']         # (B, C, T) -- native layout
    start_masks = targets['start_masks']           # (B, C, T)
    end_masks = targets['end_masks']               # (B, C, T)

    B, T, C = action_scores.shape

    # Lane-dense compute layout is (B, C, T); masks are already there, so only
    # the scores are relayouted (glue, not hot path). No dtype up-cast here.
    act_s = jnp.transpose(action_scores, (0, 2, 1))
    st_s = jnp.transpose(start_scores, (0, 2, 1))
    en_s = jnp.transpose(end_scores, (0, 2, 1))

    # Time tiling: one full-extent block if T is small, else aligned tiles
    # (tail padding is masked out inside the kernel).
    if T <= t_tile:
        TT, T_pad = T, T
    else:
        TT = t_tile
        T_pad = -(-T // TT) * TT
    NT = T_pad // TT

    def pad_t(x):
        if T_pad == T:
            return x
        return jnp.pad(x, ((0, 0), (0, 0), (0, T_pad - T)))

    big_inputs = [pad_t(a) for a in (act_s, st_s, en_s,
                                     action_masks, start_masks, end_masks)]

    cw = class_weights.reshape(1, C, 1).astype(jnp.float32)
    bw = boundary_weights.reshape(1, C, 1).astype(jnp.float32)

    big_spec = pl.BlockSpec((1, C, TT), lambda b, t: (b, 0, t))
    w_spec = pl.BlockSpec((1, C, 1), lambda b, t: (0, 0, 0))
    out_spec = pl.BlockSpec((1, 1, 8), lambda b, t: (b, t, 0))

    kernel = _make_loss_kernel(label_smoothing, TT, T)

    partials = pl.pallas_call(
        kernel,
        grid=(B, NT),
        out_shape=jax.ShapeDtypeStruct((B, NT, 8), jnp.float32),
        in_specs=[big_spec] * 6 + [w_spec, w_spec],
        out_specs=out_spec,
        compiler_params=pltpu.CompilerParams(
            dimension_semantics=("parallel", "parallel")),
    )(*big_inputs, cw, bw)

    sums = jnp.sum(partials, axis=(0, 1))            # (8,)
    act_sum = sums[0]
    st_valid_sum = sums[1]
    en_valid_sum = sums[2]
    st_sum = sums[3]
    en_sum = sums[4]
    valid_sum = sums[5]

    n_elem = jnp.float32(B * T * C)
    action_loss = act_sum / n_elem

    denom = valid_sum + 1e-6
    has_valid = valid_sum > 0.0
    start_loss = jnp.where(has_valid, st_valid_sum / denom, st_sum / n_elem)
    end_loss = jnp.where(has_valid, en_valid_sum / denom, en_sum / n_elem)

    total = (action_weight * action_loss
             + start_weight * start_loss
             + end_weight * end_loss)
    return {'total': total, 'action': action_loss,
            'start': start_loss, 'end': end_loss}


def _reference_jax(predictions, targets, *, action_weight, start_weight,
                   end_weight, class_weights, boundary_weights,
                   label_smoothing=0.1):
    """Pure-JAX reference mirroring the PyTorch forward (for sanity checking)."""
    def smooth(t):
        if label_smoothing <= 0:
            return t
        return t * (1.0 - label_smoothing) + 0.5 * label_smoothing

    def bce(x, z):
        return jnp.maximum(x, 0.0) - x * z + jnp.log(1.0 + jnp.exp(-jnp.abs(x)))

    am = smooth(jnp.transpose(targets['action_masks'], (0, 2, 1)))
    sm = smooth(jnp.transpose(targets['start_masks'], (0, 2, 1)))
    em = smooth(jnp.transpose(targets['end_masks'], (0, 2, 1)))

    a = bce(predictions['action_scores'], am) * class_weights.reshape(1, 1, -1)
    action_loss = a.mean()
    valid = (am.sum(axis=2, keepdims=True) > 0).astype(jnp.float32)
    s = bce(predictions['start_scores'], sm) * boundary_weights.reshape(1, 1, -1)
    e = bce(predictions['end_scores'], em) * boundary_weights.reshape(1, 1, -1)
    vs = valid.sum()
    start_loss = jnp.where(vs > 0, (s * valid).sum() / (vs + 1e-6), s.mean())
    end_loss = jnp.where(vs > 0, (e * valid).sum() / (vs + 1e-6), e.mean())
    total = (action_weight * action_loss + start_weight * start_loss
             + end_weight * end_loss)
    return {'total': total, 'action': action_loss,
            'start': start_loss, 'end': end_loss}


def _make_inputs(key, B, T, C):
    k1, k2, k3, k4, k5, k6 = jax.random.split(key, 6)
    predictions = {
        'action_scores': jax.random.normal(k1, (B, T, C), jnp.float32),
        'start_scores': jax.random.normal(k2, (B, T, C), jnp.float32),
        'end_scores': jax.random.normal(k3, (B, T, C), jnp.float32),
    }
    targets = {
        'action_masks': (jax.random.uniform(k4, (B, C, T)) > 0.7).astype(jnp.float32),
        'start_masks': jax.random.uniform(k5, (B, C, T), jnp.float32),
        'end_masks': jax.random.uniform(k6, (B, C, T), jnp.float32),
    }
    return predictions, targets


if __name__ == "__main__":
    key = jax.random.PRNGKey(0)
    k_a, k_b = jax.random.split(key)

    C = 8
    # deterministic "parameters" matching the module's __init__
    class_weights = jnp.ones((C,), jnp.float32)
    class_weights = class_weights.at[0].set(1.0).at[1].set(1.5) \
                                  .at[2].set(7.0).at[3].set(2.0).at[4].set(1.0)
    boundary_weights = jnp.ones((C,), jnp.float32).at[2].set(5.0)

    cfg = dict(action_weight=1.0, start_weight=0.5, end_weight=0.5,
               class_weights=class_weights, boundary_weights=boundary_weights,
               label_smoothing=0.1)

    # Case 1: small problem, single block (B=2, T=16, C=8)
    preds1, tgts1 = _make_inputs(k_a, 2, 16, C)
    out1 = action_detection_loss(preds1, tgts1, **cfg)
    out1 = jax.tree_util.tree_map(jax.block_until_ready, out1)
    ref1 = _reference_jax(preds1, tgts1, **cfg)
    for k in ('total', 'action', 'start', 'end'):
        assert jnp.allclose(out1[k], ref1[k], rtol=1e-5, atol=1e-5), (k, out1[k], ref1[k])

    # Case 2: unaligned T with multi-block grid + tail masking (B=2, T=300, tile=128)
    preds2, tgts2 = _make_inputs(k_b, 2, 300, C)
    out2 = action_detection_loss(preds2, tgts2, t_tile=128, **cfg)
    out2 = jax.tree_util.tree_map(jax.block_until_ready, out2)
    ref2 = _reference_jax(preds2, tgts2, **cfg)
    for k in ('total', 'action', 'start', 'end'):
        assert jnp.allclose(out2[k], ref2[k], rtol=1e-5, atol=1e-5), (k, out2[k], ref2[k])

    print("KERNEL_OK")
</pallas_src>

<mosaic_0001>
module attributes {stable_mosaic.version = 11 : i64} {
  func.func @kernel(%arg0: i32, %arg1: i32, %arg2: memref<1x8x16xf32, #tpu.memory_space<vmem>>, %arg3: memref<1x8x16xf32, #tpu.memory_space<vmem>>, %arg4: memref<1x8x16xf32, #tpu.memory_space<vmem>>, %arg5: memref<1x8x16xf32, #tpu.memory_space<vmem>>, %arg6: memref<1x8x16xf32, #tpu.memory_space<vmem>>, %arg7: memref<1x8x16xf32, #tpu.memory_space<vmem>>, %arg8: memref<1x8x1xf32, #tpu.memory_space<vmem>>, %arg9: memref<1x8x1xf32, #tpu.memory_space<vmem>>, %arg10: memref<1x1x8xf32, #tpu.memory_space<vmem>>) attributes {dimension_semantics = [#tpu.dimension_semantics<parallel>, #tpu.dimension_semantics<parallel>], iteration_bounds = array<i64: 2, 1>, scalar_prefetch = 0 : i64, scratch_operands = 0 : i64, tpu.core_type = #tpu.core_type<tc>, window_params = [{transform_indices = @transform_0, window_bounds = array<i64: 1, 8, 16>}, {transform_indices = @transform_1, window_bounds = array<i64: 1, 8, 16>}, {transform_indices = @transform_2, window_bounds = array<i64: 1, 8, 16>}, {transform_indices = @transform_3, window_bounds = array<i64: 1, 8, 16>}, {transform_indices = @transform_4, window_bounds = array<i64: 1, 8, 16>}, {transform_indices = @transform_5, window_bounds = array<i64: 1, 8, 16>}, {pipeline_mode = #tpu.pipeline_mode<synchronous>, transform_indices = @transform_6, window_bounds = array<i64: 1, 8, 1>}, {pipeline_mode = #tpu.pipeline_mode<synchronous>, transform_indices = @transform_7, window_bounds = array<i64: 1, 8, 1>}, {transform_indices = @transform_8, window_bounds = array<i64: 1, 1, 8>}]} {
    %c0 = arith.constant 0 : index
    %c0_0 = arith.constant 0 : index
    %c0_1 = arith.constant 0 : index
    %0 = vector.load %arg2[%c0, %c0_0, %c0_1] : memref<1x8x16xf32, #tpu.memory_space<vmem>>, vector<1x8x16xf32>
    %c0_2 = arith.constant 0 : index
    %c0_3 = arith.constant 0 : index
    %c0_4 = arith.constant 0 : index
    %1 = vector.load %arg3[%c0_2, %c0_3, %c0_4] : memref<1x8x16xf32, #tpu.memory_space<vmem>>, vector<1x8x16xf32>
    %c0_5 = arith.constant 0 : index
    %c0_6 = arith.constant 0 : index
    %c0_7 = arith.constant 0 : index
    %2 = vector.load %arg4[%c0_5, %c0_6, %c0_7] : memref<1x8x16xf32, #tpu.memory_space<vmem>>, vector<1x8x16xf32>
    %c0_8 = arith.constant 0 : index
    %c0_9 = arith.constant 0 : index
    %c0_10 = arith.constant 0 : index
    %3 = vector.load %arg5[%c0_8, %c0_9, %c0_10] : memref<1x8x16xf32, #tpu.memory_space<vmem>>, vector<1x8x16xf32>
    %c0_11 = arith.constant 0 : index
    %c0_12 = arith.constant 0 : index
    %c0_13 = arith.constant 0 : index
    %4 = vector.load %arg6[%c0_11, %c0_12, %c0_13] : memref<1x8x16xf32, #tpu.memory_space<vmem>>, vector<1x8x16xf32>
    %c0_14 = arith.constant 0 : index
    %c0_15 = arith.constant 0 : index
    %c0_16 = arith.constant 0 : index
    %5 = vector.load %arg7[%c0_14, %c0_15, %c0_16] : memref<1x8x16xf32, #tpu.memory_space<vmem>>, vector<1x8x16xf32>
    %cst = arith.constant 0.899999976 : f32
    %6 = vector.broadcast %cst : f32 to vector<1x8x16xf32>
    %7 = arith.mulf %3, %6 : vector<1x8x16xf32>
    %cst_17 = arith.constant 5.000000e-02 : f32
    %8 = vector.broadcast %cst_17 : f32 to vector<1x8x16xf32>
    %9 = arith.addf %7, %8 : vector<1x8x16xf32>
    %cst_18 = arith.constant 0.899999976 : f32
    %10 = vector.broadcast %cst_18 : f32 to vector<1x8x16xf32>
    %11 = arith.mulf %4, %10 : vector<1x8x16xf32>
    %cst_19 = arith.constant 5.000000e-02 : f32
    %12 = vector.broadcast %cst_19 : f32 to vector<1x8x16xf32>
    %13 = arith.addf %11, %12 : vector<1x8x16xf32>
    %cst_20 = arith.constant 0.899999976 : f32
    %14 = vector.broadcast %cst_20 : f32 to vector<1x8x16xf32>
    %15 = arith.mulf %5, %14 : vector<1x8x16xf32>
    %cst_21 = arith.constant 5.000000e-02 : f32
    %16 = vector.broadcast %cst_21 : f32 to vector<1x8x16xf32>
    %17 = arith.addf %15, %16 : vector<1x8x16xf32>
    %c0_22 = arith.constant 0 : index
    %c0_23 = arith.constant 0 : index
    %c0_24 = arith.constant 0 : index
    %18 = vector.load %arg8[%c0_22, %c0_23, %c0_24] : memref<1x8x1xf32, #tpu.memory_space<vmem>>, vector<1x8x1xf32>
    %c0_25 = arith.constant 0 : index
    %c0_26 = arith.constant 0 : index
    %c0_27 = arith.constant 0 : index
    %19 = vector.load %arg9[%c0_25, %c0_26, %c0_27] : memref<1x8x1xf32, #tpu.memory_space<vmem>>, vector<1x8x1xf32>
    %c16_i32 = arith.constant 16 : i32
    %20 = arith.muli %arg1, %c16_i32 : i32
    %21 = tpu.iota {dimensions = array<i32: 2>} : vector<1x1x16xi32>
    %22 = vector.broadcast %20 : i32 to vector<1x1x16xi32>
    %23 = arith.addi %21, %22 : vector<1x1x16xi32>
    %c16_i32_28 = arith.constant 16 : i32
    %24 = vector.broadcast %c16_i32_28 : i32 to vector<1x1x16xi32>
    %25 = arith.cmpi slt, %23, %24 : vector<1x1x16xi32>
    %26 = arith.extui %25 : vector<1x1x16xi1> to vector<1x1x16xi32>
    %27 = arith.sitofp %26 : vector<1x1x16xi32> to vector<1x1x16xf32>
    %cst_29 = arith.constant 0.000000e+00 : f32
    %28 = vector.broadcast %cst_29 : f32 to vector<1x8x16xf32>
    %29 = arith.maximumf %0, %28 : vector<1x8x16xf32>
    %30 = arith.mulf %0, %9 : vector<1x8x16xf32>
    %31 = arith.subf %29, %30 : vector<1x8x16xf32>
    %32 = math.absf %0 : vector<1x8x16xf32>
    %cst_30 = arith.constant 0.000000e+00 : f32
    %33 = vector.broadcast %cst_30 : f32 to vector<1x8x16xf32>
    %34 = arith.subf %33, %32 : vector<1x8x16xf32>
    %35 = math.exp %34 : vector<1x8x16xf32>
    %cst_31 = arith.constant 1.000000e+00 : f32
    %36 = vector.broadcast %cst_31 : f32 to vector<1x8x16xf32>
    %37 = arith.addf %36, %35 : vector<1x8x16xf32>
    %38 = math.log %37 : vector<1x8x16xf32>
    %39 = arith.addf %31, %38 : vector<1x8x16xf32>
    %40 = vector.broadcast %18 : vector<1x8x1xf32> to vector<1x8x16xf32>
    %41 = arith.mulf %39, %40 : vector<1x8x16xf32>
    %cst_32 = arith.constant 0.000000e+00 : f32
    %42 = vector.broadcast %cst_32 : f32 to vector<1x8x16xf32>
    %43 = arith.maximumf %1, %42 : vector<1x8x16xf32>
    %44 = arith.mulf %1, %13 : vector<1x8x16xf32>
    %45 = arith.subf %43, %44 : vector<1x8x16xf32>
    %46 = math.absf %1 : vector<1x8x16xf32>
    %cst_33 = arith.constant 0.000000e+00 : f32
    %47 = vector.broadcast %cst_33 : f32 to vector<1x8x16xf32>
    %48 = arith.subf %47, %46 : vector<1x8x16xf32>
    %49 = math.exp %48 : vector<1x8x16xf32>
    %cst_34 = arith.constant 1.000000e+00 : f32
    %50 = vector.broadcast %cst_34 : f32 to vector<1x8x16xf32>
    %51 = arith.addf %50, %49 : vector<1x8x16xf32>
    %52 = math.log %51 : vector<1x8x16xf32>
    %53 = arith.addf %45, %52 : vector<1x8x16xf32>
    %54 = vector.broadcast %19 : vector<1x8x1xf32> to vector<1x8x16xf32>
    %55 = arith.mulf %53, %54 : vector<1x8x16xf32>
    %cst_35 = arith.constant 0.000000e+00 : f32
    %56 = vector.broadcast %cst_35 : f32 to vector<1x8x16xf32>
    %57 = arith.maximumf %2, %56 : vector<1x8x16xf32>
    %58 = arith.mulf %2, %17 : vector<1x8x16xf32>
    %59 = arith.subf %57, %58 : vector<1x8x16xf32>
    %60 = math.absf %2 : vector<1x8x16xf32>
    %cst_36 = arith.constant 0.000000e+00 : f32
    %61 = vector.broadcast %cst_36 : f32 to vector<1x8x16xf32>
    %62 = arith.subf %61, %60 : vector<1x8x16xf32>
    %63 = math.exp %62 : vector<1x8x16xf32>
    %cst_37 = arith.constant 1.000000e+00 : f32
    %64 = vector.broadcast %cst_37 : f32 to vector<1x8x16xf32>
    %65 = arith.addf %64, %63 : vector<1x8x16xf32>
    %66 = math.log %65 : vector<1x8x16xf32>
    %67 = arith.addf %59, %66 : vector<1x8x16xf32>
    %68 = vector.broadcast %19 : vector<1x8x1xf32> to vector<1x8x16xf32>
    %69 = arith.mulf %67, %68 : vector<1x8x16xf32>
    %cst_38 = arith.constant dense<0.000000e+00> : vector<1x16xf32>
    %70 = vector.multi_reduction <add>, %9, %cst_38 [1] : vector<1x8x16xf32> to vector<1x16xf32>
    %71 = vector.shape_cast %70 : vector<1x16xf32> to vector<1x1x16xf32>
    %cst_39 = arith.constant 0.000000e+00 : f32
    %72 = vector.broadcast %cst_39 : f32 to vector<1x1x16xf32>
    %73 = arith.cmpf ogt, %71, %72 : vector<1x1x16xf32>
    %74 = arith.extui %73 : vector<1x1x16xi1> to vector<1x1x16xi32>
    %75 = arith.sitofp %74 : vector<1x1x16xi32> to vector<1x1x16xf32>
    %76 = arith.mulf %75, %27 : vector<1x1x16xf32>
    %77 = vector.broadcast %27 : vector<1x1x16xf32> to vector<1x8x16xf32>
    %78 = arith.mulf %41, %77 : vector<1x8x16xf32>
    %79 = vector.shape_cast %78 : vector<1x8x16xf32> to vector<1x1x8x16xf32>
    %cst_40 = arith.constant dense<0.000000e+00> : vector<1xf32>
    %80 = vector.multi_reduction <add>, %79, %cst_40 [1, 2, 3] : vector<1x1x8x16xf32> to vector<1xf32>
    %81 = vector.shape_cast %80 : vector<1xf32> to vector<1x1x1x1xf32>
    %82 = vector.extract %81[0, 0, 0, 0] : f32 from vector<1x1x1x1xf32>
    %83 = vector.broadcast %76 : vector<1x1x16xf32> to vector<1x8x16xf32>
    %84 = arith.mulf %55, %83 : vector<1x8x16xf32>
    %85 = vector.shape_cast %84 : vector<1x8x16xf32> to vector<1x1x8x16xf32>
    %cst_41 = arith.constant dense<0.000000e+00> : vector<1xf32>
    %86 = vector.multi_reduction <add>, %85, %cst_41 [1, 2, 3] : vector<1x1x8x16xf32> to vector<1xf32>
    %87 = vector.shape_cast %86 : vector<1xf32> to vector<1x1x1x1xf32>
    %88 = vector.extract %87[0, 0, 0, 0] : f32 from vector<1x1x1x1xf32>
    %89 = vector.broadcast %76 : vector<1x1x16xf32> to vector<1x8x16xf32>
    %90 = arith.mulf %69, %89 : vector<1x8x16xf32>
    %91 = vector.shape_cast %90 : vector<1x8x16xf32> to vector<1x1x8x16xf32>
    %cst_42 = arith.constant dense<0.000000e+00> : vector<1xf32>
    %92 = vector.multi_reduction <add>, %91, %cst_42 [1, 2, 3] : vector<1x1x8x16xf32> to vector<1xf32>
    %93 = vector.shape_cast %92 : vector<1xf32> to vector<1x1x1x1xf32>
    %94 = vector.extract %93[0, 0, 0, 0] : f32 from vector<1x1x1x1xf32>
    %95 = vector.broadcast %27 : vector<1x1x16xf32> to vector<1x8x16xf32>
    %96 = arith.mulf %55, %95 : vector<1x8x16xf32>
    %97 = vector.shape_cast %96 : vector<1x8x16xf32> to vector<1x1x8x16xf32>
    %cst_43 = arith.constant dense<0.000000e+00> : vector<1xf32>
    %98 = vector.multi_reduction <add>, %97, %cst_43 [1, 2, 3] : vector<1x1x8x16xf32> to vector<1xf32>
    %99 = vector.shape_cast %98 : vector<1xf32> to vector<1x1x1x1xf32>
    %100 = vector.extract %99[0, 0, 0, 0] : f32 from vector<1x1x1x1xf32>
    %101 = vector.broadcast %27 : vector<1x1x16xf32> to vector<1x8x16xf32>
    %102 = arith.mulf %69, %101 : vector<1x8x16xf32>
    %103 = vector.shape_cast %102 : vector<1x8x16xf32> to vector<1x1x8x16xf32>
    %cst_44 = arith.constant dense<0.000000e+00> : vector<1xf32>
    %104 = vector.multi_reduction <add>, %103, %cst_44 [1, 2, 3] : vector<1x1x8x16xf32> to vector<1xf32>
    %105 = vector.shape_cast %104 : vector<1xf32> to vector<1x1x1x1xf32>
    %106 = vector.extract %105[0, 0, 0, 0] : f32 from vector<1x1x1x1xf32>
    %107 = vector.shape_cast %76 : vector<1x1x16xf32> to vector<1x1x1x16xf32>
    %cst_45 = arith.constant dense<0.000000e+00> : vector<1xf32>
    %108 = vector.multi_reduction <add>, %107, %cst_45 [1, 2, 3] : vector<1x1x1x16xf32> to vector<1xf32>
    %109 = vector.shape_cast %108 : vector<1xf32> to vector<1x1x1x1xf32>
    %110 = vector.extract %109[0, 0, 0, 0] : f32 from vector<1x1x1x1xf32>
    %111 = tpu.iota {dimensions = array<i32: 2>} : vector<1x1x8xi32>
    %c0_i32 = arith.constant 0 : i32
    %112 = vector.broadcast %c0_i32 : i32 to vector<1x1x8xi32>
    %113 = arith.cmpi eq, %111, %112 : vector<1x1x8xi32>
    %cst_46 = arith.constant 0.000000e+00 : f32
    %114 = vector.broadcast %82 : f32 to vector<1x1x8xf32>
    %115 = vector.broadcast %cst_46 : f32 to vector<1x1x8xf32>
    %116 = arith.select %113, %114, %115 : vector<1x1x8xi1>, vector<1x1x8xf32>
    %c1_i32 = arith.constant 1 : i32
    %117 = vector.broadcast %c1_i32 : i32 to vector<1x1x8xi32>
    %118 = arith.cmpi eq, %111, %117 : vector<1x1x8xi32>
    %cst_47 = arith.constant 0.000000e+00 : f32
    %119 = vector.broadcast %88 : f32 to vector<1x1x8xf32>
    %120 = vector.broadcast %cst_47 : f32 to vector<1x1x8xf32>
    %121 = arith.select %118, %119, %120 : vector<1x1x8xi1>, vector<1x1x8xf32>
    %122 = arith.addf %116, %121 : vector<1x1x8xf32>
    %c2_i32 = arith.constant 2 : i32
    %123 = vector.broadcast %c2_i32 : i32 to vector<1x1x8xi32>
    %124 = arith.cmpi eq, %111, %123 : vector<1x1x8xi32>
    %cst_48 = arith.constant 0.000000e+00 : f32
    %125 = vector.broadcast %94 : f32 to vector<1x1x8xf32>
    %126 = vector.broadcast %cst_48 : f32 to vector<1x1x8xf32>
    %127 = arith.select %124, %125, %126 : vector<1x1x8xi1>, vector<1x1x8xf32>
    %128 = arith.addf %122, %127 : vector<1x1x8xf32>
    %c3_i32 = arith.constant 3 : i32
    %129 = vector.broadcast %c3_i32 : i32 to vector<1x1x8xi32>
    %130 = arith.cmpi eq, %111, %129 : vector<1x1x8xi32>
    %cst_49 = arith.constant 0.000000e+00 : f32
    %131 = vector.broadcast %100 : f32 to vector<1x1x8xf32>
    %132 = vector.broadcast %cst_49 : f32 to vector<1x1x8xf32>
    %133 = arith.select %130, %131, %132 : vector<1x1x8xi1>, vector<1x1x8xf32>
    %134 = arith.addf %128, %133 : vector<1x1x8xf32>
    %c4_i32 = arith.constant 4 : i32
    %135 = vector.broadcast %c4_i32 : i32 to vector<1x1x8xi32>
    %136 = arith.cmpi eq, %111, %135 : vector<1x1x8xi32>
    %cst_50 = arith.constant 0.000000e+00 : f32
    %137 = vector.broadcast %106 : f32 to vector<1x1x8xf32>
    %138 = vector.broadcast %cst_50 : f32 to vector<1x1x8xf32>
    %139 = arith.select %136, %137, %138 : vector<1x1x8xi1>, vector<1x1x8xf32>
    %140 = arith.addf %134, %139 : vector<1x1x8xf32>
    %c5_i32 = arith.constant 5 : i32
    %141 = vector.broadcast %c5_i32 : i32 to vector<1x1x8xi32>
    %142 = arith.cmpi eq, %111, %141 : vector<1x1x8xi32>
    %cst_51 = arith.constant 0.000000e+00 : f32
    %143 = vector.broadcast %110 : f32 to vector<1x1x8xf32>
    %144 = vector.broadcast %cst_51 : f32 to vector<1x1x8xf32>
    %145 = arith.select %142, %143, %144 : vector<1x1x8xi1>, vector<1x1x8xf32>
    %146 = arith.addf %140, %145 : vector<1x1x8xf32>
    %c0_52 = arith.constant 0 : index
    %c0_53 = arith.constant 0 : index
    %c0_54 = arith.constant 0 : index
    %147 = vector.load %arg10[%c0_52, %c0_53, %c0_54] : memref<1x1x8xf32, #tpu.memory_space<vmem>>, vector<1x1x8xf32>
    tpu.vector_store %arg10[%c0_52, %c0_53, %c0_54], %146 {strides = array<i32>} : memref<1x1x8xf32, #tpu.memory_space<vmem>>, vector<1x1x8xf32>,
    return
  }
  func.func @transform_0(%arg0: i32, %arg1: i32) -> (i32, i32, i32) {
    %c0_i32 = arith.constant 0 : i32
    %c0_i32_0 = arith.constant 0 : i32
    return %arg0, %c0_i32, %arg1 : i32, i32, i32
  }
  func.func @transform_1(%arg0: i32, %arg1: i32) -> (i32, i32, i32) {
    %c0_i32 = arith.constant 0 : i32
    %c0_i32_0 = arith.constant 0 : i32
    return %arg0, %c0_i32, %arg1 : i32, i32, i32
  }
  func.func @transform_2(%arg0: i32, %arg1: i32) -> (i32, i32, i32) {
    %c0_i32 = arith.constant 0 : i32
    %c0_i32_0 = arith.constant 0 : i32
    return %arg0, %c0_i32, %arg1 : i32, i32, i32
  }
  func.func @transform_3(%arg0: i32, %arg1: i32) -> (i32, i32, i32) {
    %c0_i32 = arith.constant 0 : i32
    %c0_i32_0 = arith.constant 0 : i32
    return %arg0, %c0_i32, %arg1 : i32, i32, i32
  }
  func.func @transform_4(%arg0: i32, %arg1: i32) -> (i32, i32, i32) {
    %c0_i32 = arith.constant 0 : i32
    %c0_i32_0 = arith.constant 0 : i32
    return %arg0, %c0_i32, %arg1 : i32, i32, i32
  }
  func.func @transform_5(%arg0: i32, %arg1: i32) -> (i32, i32, i32) {
    %c0_i32 = arith.constant 0 : i32
    %c0_i32_0 = arith.constant 0 : i32
    return %arg0, %c0_i32, %arg1 : i32, i32, i32
  }
  func.func @transform_6(%arg0: i32, %arg1: i32) -> (i32, i32, i32) {
    %c0_i32 = arith.constant 0 : i32
    %c0_i32_0 = arith.constant 0 : i32
    %c0_i32_1 = arith.constant 0 : i32
    %c0_i32_2 = arith.constant 0 : i32
    return %c0_i32, %c0_i32_0, %c0_i32_1 : i32, i32, i32
  }
  func.func @transform_7(%arg0: i32, %arg1: i32) -> (i32, i32, i32) {
    %c0_i32 = arith.constant 0 : i32
    %c0_i32_0 = arith.constant 0 : i32
    %c0_i32_1 = arith.constant 0 : i32
    %c0_i32_2 = arith.constant 0 : i32
    return %c0_i32, %c0_i32_0, %c0_i32_1 : i32, i32, i32
  }
  func.func @transform_8(%arg0: i32, %arg1: i32) -> (i32, i32, i32) {
    %c0_i32 = arith.constant 0 : i32
    %c0_i32_0 = arith.constant 0 : i32
    return %arg0, %arg1, %c0_i32 : i32, i32, i32
  }
}

</mosaic_0001>

<bundles_post_ra>
// kernel: tpu_custom_call.1
= control target key start
LH: loop header
LB: loop body
LE: loop exit
PB: predicated region body
PF: predicated region fallthrough
CT: control target
= control target key end

     0   :  { %s1591_s0 = inlined_call_operand.vmem [shape: f32[2,8,16], index: 0, kind: input, shape index: {}]   ;;  %s1592_s1 = inlined_call_operand.hbm [shape: f32[2,8,16], index: 1, kind: input, shape index: {}]   ;;  %s1593_s2 = inlined_call_operand.hbm [shape: f32[2,8,16], index: 2, kind: input, shape index: {}]   ;;  %s1594_s3 = inlined_call_operand.hbm [shape: f32[2,8,16], index: 3, kind: input, shape index: {}]   ;;  %s1595_s4 = inlined_call_operand.vmem [shape: f32[2,8,16], index: 4, kind: input, shape index: {}]   ;;  %s1596_s5 = inlined_call_operand.hbm [shape: f32[2,8,16], index: 5, kind: input, shape index: {}]   ;;  %s1597_s6 = inlined_call_operand.vmem [shape: f32[1,8,1], index: 6, kind: input, shape index: {}]   ;;  %s1598_s7 = inlined_call_operand.vmem [shape: f32[1,8,1], index: 7, kind: input, shape index: {}]   ;;  %s1599_s8 = inlined_call_operand.hbm [shape: f32[2,1,8], index: 8, kind: output, shape index: {}]  }
   0x1   :  { %1614 = sst [smem:[#allocation23_spill]] %s1593_s2 }
   0x2   :  { %1615 = sst [smem:[#allocation24_spill]] %s1599_s8 }
   0x3   :  { %13 = vsyncpa [#allocation3], 0 }
   0x4   :  { %15 = vsyncpa [#allocation3 + $0x1], 0 }
   0x5   :  { %16 = vsyncpa [#allocation6], 0 }
   0x6   :  { %18 = vsyncpa [#allocation6 + $0x1], 0 }
   0x7   :  { %19 = vsyncpa [#allocation9], 0 }
   0x8   :  { %21 = vsyncpa [#allocation9 + $0x1], 0 }
   0x9   :  { %22 = vsyncpa [#allocation4], 0 }
   0xa   :  { %24 = vsyncpa [#allocation4 + $0x1], 0  ;;  %s1262_s27 = smov 0   ;;  %s1264_s28 = smov 0  }
   0xb   :  { %s1266_s29 = smov 0   ;;  %s1268_s30 = smov 0  }
   0xc   :  { %s1270_s9 = smov 0   ;;  %s1272_s10 = smov 0  }
   0xd LB: > { %1616 = sst [smem:[#allocation15_spill]] %s1188_s27  ;;  %s1293_s11 = sadd.s32 4294967295, %s1208_s10   ;;  %s1208_s10 = sphi %s1272_s10, %s30_s10   ;;  %s1204_s9 = sphi %s1270_s9, %s1649_s9   ;;  %s1200_s30 = sphi %s1268_s30, %s1648_s30   ;;  %s1196_s29 = sphi %s1266_s29, %s1647_s29   ;;  %s1192_s28 = sphi %s1264_s28, %s1651_s28   ;;  %s1188_s27 = sphi %s1262_s27, %s1650_s27  }
   0xe   : > { %1617 = sst [smem:[#allocation16_spill]] %s1196_s29  ;;  %s871_s12 = sadd.s32 4294967294, %s1208_s10  }
   0xf   : > { %1618 = sst [smem:[#allocation17_spill]] %s1204_s9  ;;  %s42_s13 = sadd.s32 1, %s1204_s9 }
  0x10   : > { %1619 = sst [smem:[#allocation18_spill]] %s1208_s10  ;;  %s79_s14 = sadd.s32 1, %s1196_s29 }
  0x11   : > { %p44_p0 = scmp.ge.s32.totalorder %s42_s13, 2  ;;  %p86_p1 = scmp.ne.s32.totalorder %s1196_s29, %s1192_s28 }
  0x12   : > { %p87_p2 = scmp.eq.s32.totalorder %s1208_s10, 0  ;;  %p92_p3 = scmp.ne.s32.totalorder %s1192_s28, %s1188_s27 }
  0x13   : > { %s1653_s13 = smov (%p44_p0, %s42_s13), 0  ;;  %p93_p5 = scmp.eq.s32.totalorder %s1293_s11, 0 }
  0x14   : > { %1620 = sst [smem:[#allocation19_spill]] %s1653_s13  ;;  %p1305_p4 = por %p87_p2, %p86_p1 }
  0x15   : > { %s74_s16 = ssub.s32 %s1204_s9, %s1653_s13  ;;  %p272_p6 = scmp.eq.s32.totalorder %s1293_s11, 1 }
  0x16   : > { %p77_p7 = scmp.eq.s32.totalorder %s74_s16, 0  ;;  %p1313_p8 = por %p93_p5, %p92_p3 }
  0x17   : > { %p1317_p9 = por %p272_p6, %p86_p1  ;;  %p278_p10 = scmp.eq.s32.totalorder %s871_s12, 1 }
  0x18   : > { %s1622_s17 = scalar_select %p1313_p8, 1, 0 }
  0x19   : > { %s1623_s18 = scalar_select %p1317_p9, 1, 0 }
  0x1a   : > { %s1322_s19 = scalar_select %p77_p7, %s1196_s29, %s79_s14  }
  0x1b   : > { %1624 = sst [smem:[#allocation20_spill]] %s1623_s18  ;;  %p1324_p11 = por %p278_p10, %p92_p3 }
  0x1c   : > { %1625 = sst [smem:[#allocation21_spill]] %s1322_s19  ;;  %p933_p13 = scmp.lt.s32.totalorder %s1208_s10, 2 }
  0x1d   : > { %s1626_s20 = scalar_select %p1324_p11, 1, 0 }
  0x1e   : > { %s1331_s21 = sand.u32 1, %s1196_s29   ;;  %s1337_s23 = sshll.u32 %s1204_s9, 7 }
  0x1f   : > { %1627 = sst [smem:[#allocation22_spill]] %s1626_s20  ;;  %s1334_s22 = sshll.u32 %s1331_s21, 3 }
  0x20   : > { %p1341_p0 = pnand %p933_p13, %p1305_p4  ;;  %s333_s25 = sand.u32 1, %s1208_s10  }
  0x21   : > { %s1629_s2 = sld [smem:[#allocation23_spill]]  ;;  %s337_s16 = scalar_lea.vmem [#allocation5], %s1334_s22 }
  0x22   : > { %s1628_s24 = scalar_select %p1341_p0, 1, 0 }
  0x23   : > { %s345_s13 = sshll.u32 %s337_s16, 4  ;;  %s1357_s15 = scalar_lea.sflag [#allocation6], %s333_s25  ;;  %s1354_s13 = int_to_ptr.vmem [resolvable:$true] %s345_s13 }
  0x24   : > { %p1363_p4 = pneg %p1341_p0 }
  0x27   : > { %s1350_s14 = scalar_lea.hbm %s1629_s2, %s1337_s23  ;;  %s1003_s16 = scalar_lea.hbm %s1629_s2, 256 }
  0x28   : > { %s998_s9 = scalar_lea.hbm %s1350_s14, 128  ;;  %p1004_p7 = scmp.lt.u32.totalorder %s1350_s14, %s1629_s2 }
  0x29   : > { %p999_p3 = scmp.ne.s32.totalorder %s1350_s14, %s998_s9  ;;  %p1005_p10 = scmp.lt.u32.totalorder %s1003_s16, %s998_s9 }
  0x2a   : > { %p1007_p12 = scmp.lt.u32.totalorder %s998_s9, %s1350_s14 }
  0x2b   : > { %p1001_p5 = pnand %p1363_p4, %p999_p3  ;;  %p1006_p13 = por %p1005_p10, %p1004_p7 }
  0x2d   : > { %p1002_p6 = pneg %p1001_p5  ;;  %p1008_p1 = por %p1007_p12, %p1006_p13 }
  0x2f   : > { %p1009_p2 = pnand %p1008_p1, %p1002_p6 }
  0x31   : > { %1012 = shalt.err (!%p1009_p2)
}
  0x32   : > { %s1013_s25 = scalar_lea.vmem %s1354_s13, 128  ;;  %s1210_s26 = smov [#allocation5]  }
  0x33   : > { %p1014_p3 = scmp.ne.s32.totalorder %s1354_s13, %s1013_s25  ;;  %s1018_s12 = sshll.u32 %s1210_s26, 4  ;;  %s1019_s12 = int_to_ptr.vmem [resolvable:$false] %s1018_s12 }
  0x34   : > { %s1020_s29 = scalar_lea.vmem %s1019_s12, 256  ;;  %p1021_p9 = scmp.lt.s32.totalorder %s1354_s13, %s1019_s12 }
  0x35   : > { %p1016_p5 = pnand %p1014_p3, %p1363_p4  ;;  %p1022_p8 = scmp.lt.s32.totalorder %s1020_s29, %s1013_s25 }
  0x37   : > { %p1017_p11 = pneg %p1016_p5  ;;  %p1023_p7 = por %p1022_p8, %p1021_p9 }
  0x39   : > { %p1024_p10 = pnand %p1023_p7, %p1017_p11 }
  0x3b   : > { %1027 = shalt.err (!%p1024_p10)
}
  0x3c   : > { %922 = dma.hbm_to_vmem [thread:$0]  (!%p1341_p0), %s1350_s14, 128, %s1354_s13, %s1357_s15  }
  0x3d   : > { %p1631_p12 = scmp.lt.s32.totalorder %s1208_s10, 3  ;;  %p1632_p1 = scmp.ge.s32.totalorder %s1208_s10, 1 }
  0x3e   : > { %s1399_s25 = scalar_lea.hbm %s1592_s1, %s1337_s23  ;;  %s318_s26 = scalar_lea.vmem [#allocation2], %s1334_s22 }
  0x3f   : > { %p1391_p2 = pnand %p1632_p1, %p1631_p12  ;;  %s326_s12 = sshll.u32 %s318_s26, 4  ;;  %s1402_s12 = int_to_ptr.vmem [resolvable:$true] %s326_s12 }
  0x40   : > { %s1408_s29 = scalar_lea.hbm %s1594_s3, %s1337_s23  ;;  %s315_s2 = scalar_lea.sflag [#allocation3], %s1331_s21 }
  0x41   : > { %s1633_s9 = scalar_select %p1391_p2, 1, 0 }
  0x42   : > { %s1028_s10 = scalar_lea.hbm %s1399_s25, 128  ;;  %s1033_s27 = scalar_lea.hbm %s1592_s1, 256 }
  0x43   : > { %p1029_p8 = scmp.ne.s32.totalorder %s1399_s25, %s1028_s10  ;;  %p1034_p6 = scmp.lt.u32.totalorder %s1399_s25, %s1592_s1 }
  0x44   : > { %p1035_p13 = scmp.lt.u32.totalorder %s1033_s27, %s1028_s10  ;;  %p1037_p5 = scmp.lt.u32.totalorder %s1028_s10, %s1399_s25 }
  0x45   : > { %p1031_p9 = pnand %p1029_p8, %p1363_p4 }
  0x46   : > { %p1036_p3 = por %p1035_p13, %p1034_p6 }
  0x47   : > { %p1032_p11 = pneg %p1031_p9 }
  0x48   : > { %p1038_p7 = por %p1037_p5, %p1036_p3 }
  0x4a   : > { %p1039_p10 = pnand %p1038_p7, %p1032_p11 }
  0x4c   : > { %1042 = shalt.err (!%p1039_p10)
}
  0x4d   : > { %s1043_s26 = scalar_lea.vmem %s1402_s12, 128  ;;  %s1211_s13 = smov [#allocation2]  }
  0x4e   : > { %p1044_p12 = scmp.ne.s32.totalorder %s1402_s12, %s1043_s26  ;;  %s1048_s14 = sshll.u32 %s1211_s13, 4  ;;  %s1049_s14 = int_to_ptr.vmem [resolvable:$false] %s1048_s14 }
  0x4f   : > { %s1050_s8 = scalar_lea.vmem %s1049_s14, 256  ;;  %p1051_p9 = scmp.lt.s32.totalorder %s1402_s12, %s1049_s14 }
  0x50   : > { %p1046_p1 = pnand %p1044_p12, %p1363_p4  ;;  %p1052_p2 = scmp.lt.s32.totalorder %s1050_s8, %s1043_s26 }
  0x52   : > { %p1047_p8 = pneg %p1046_p1  ;;  %p1053_p6 = por %p1052_p2, %p1051_p9 }
  0x54   : > { %p1054_p13 = pnand %p1053_p6, %p1047_p8 }
  0x56   : > { %1057 = shalt.err (!%p1054_p13)
}
  0x57   : > { %919 = dma.hbm_to_vmem [thread:$0]  (!%p1341_p0), %s1399_s25, 128, %s1402_s12, %s315_s2  }
  0x58   : > { %s356_s27 = scalar_lea.vmem [#allocation7], %s1334_s22  ;;  %s1058_s18 = scalar_lea.hbm %s1408_s29, 128 }
  0x59   : > { %s364_s10 = sshll.u32 %s356_s27, 4  ;;  %p1059_p11 = scmp.ne.s32.totalorder %s1408_s29, %s1058_s18  ;;  %s365_s10 = int_to_ptr.vmem [resolvable:$true] %s364_s10 }
  0x5a   : > { %s1063_s26 = scalar_lea.hbm %s1594_s3, 256  ;;  %p1064_p5 = scmp.lt.u32.totalorder %s1408_s29, %s1594_s3 }
  0x5b   : > { %p1061_p2 = pnand %p1059_p11, %p1363_p4  ;;  %p1065_p7 = scmp.lt.u32.totalorder %s1063_s26, %s1058_s18 }
  0x5c   : > { %p1067_p12 = scmp.lt.u32.totalorder %s1058_s18, %s1408_s29 }
  0x5d   : > { %p1062_p3 = pneg %p1061_p2  ;;  %p1066_p10 = por %p1065_p7, %p1064_p5 }
  0x5f   : > { %p1068_p1 = por %p1067_p12, %p1066_p10 }
  0x61   : > { %p1069_p8 = pnand %p1068_p1, %p1062_p3 }
  0x63   : > { %1072 = shalt.err (!%p1069_p8)
}
  0x64   : > { %s1073_s2 = scalar_lea.vmem %s365_s10, 128  ;;  %s1212_s25 = smov [#allocation7]  }
  0x65   : > { %p1074_p9 = scmp.ne.s32.totalorder %s365_s10, %s1073_s2  ;;  %s1078_s12 = sshll.u32 %s1212_s25, 4  ;;  %s1079_s12 = int_to_ptr.vmem [resolvable:$false] %s1078_s12 }
  0x66   : > { %s1080_s8 = scalar_lea.vmem %s1079_s12, 256  ;;  %p1081_p11 = scmp.lt.s32.totalorder %s365_s10, %s1079_s12 }
  0x67   : > { %p1076_p6 = pnand %p1074_p9, %p1363_p4  ;;  %p1082_p2 = scmp.lt.s32.totalorder %s1080_s8, %s1073_s2 }
  0x69   : > { %p1077_p13 = pneg %p1076_p6  ;;  %p1083_p0 = por %p1082_p2, %p1081_p11 }
  0x6b   : > { %p1084_p5 = pnand %p1083_p0, %p1077_p13 }
  0x6d   : > { %1087 = shalt.err (!%p1084_p5)
}
  0x6e   : > { %p1634_p7 = scmp.ne.s32.totalorder %s1628_s24, 0  ;;  %s1455_s20 = scalar_lea.hbm %s1596_s5, %s1337_s23 }
  0x6f   : > { %s385_s16 = scalar_lea.vmem [#allocation8], %s1334_s22  ;;  %s382_s13 = scalar_lea.sflag [#allocation9], %s1331_s21 }
  0x70   : > { %925 = dma.hbm_to_vmem [thread:$0]  (!%p1634_p7), %s1408_s29, 128, %s365_s10, %s1357_s15  }
  0x71   : > { %s393_s26 = sshll.u32 %s385_s16, 4  ;;  %s1088_s14 = scalar_lea.hbm %s1455_s20, 128  ;;  %s394_s26 = int_to_ptr.vmem [resolvable:$true] %s393_s26 }
  0x72   : > { %p1089_p0 = scmp.ne.s32.totalorder %s1455_s20, %s1088_s14  ;;  %s1093_s29 = scalar_lea.hbm %s1596_s5, 256 }
  0x73   : > { %p1094_p12 = scmp.lt.u32.totalorder %s1455_s20, %s1596_s5  ;;  %p1095_p1 = scmp.lt.u32.totalorder %s1093_s29, %s1088_s14 }
  0x74   : > { %p1091_p3 = pnand %p1089_p0, %p1363_p4  ;;  %p1097_p9 = scmp.lt.u32.totalorder %s1088_s14, %s1455_s20 }
  0x75   : > { %p1096_p8 = por %p1095_p1, %p1094_p12 }
  0x76   : > { %p1092_p10 = pneg %p1091_p3 }
  0x77   : > { %p1098_p6 = por %p1097_p9, %p1096_p8 }
  0x79   : > { %p1099_p13 = pnand %p1098_p6, %p1092_p10 }
  0x7b   : > { %1102 = shalt.err (!%p1099_p13)
}
  0x7c   : > { %s1103_s21 = scalar_lea.vmem %s394_s26, 128  ;;  %s1213_s22 = smov [#allocation8]  }
  0x7d   : > { %p1104_p11 = scmp.ne.s32.totalorder %s394_s26, %s1103_s21  ;;  %s1108_s25 = sshll.u32 %s1213_s22, 4  ;;  %s1109_s25 = int_to_ptr.vmem [resolvable:$false] %s1108_s25 }
  0x7e   : > { %s1110_s12 = scalar_lea.vmem %s1109_s25, 256  ;;  %p1111_p0 = scmp.lt.s32.totalorder %s394_s26, %s1109_s25 }
  0x7f   : > { %p1106_p2 = pnand %p1104_p11, %p1363_p4  ;;  %p1112_p3 = scmp.lt.s32.totalorder %s1110_s12, %s1103_s21 }
  0x81   : > { %p1107_p5 = pneg %p1106_p2  ;;  %p1113_p7 = por %p1112_p3, %p1111_p0 }
  0x83   : > { %p1114_p1 = pnand %p1113_p7, %p1107_p5 }
  0x85   : > { %1117 = shalt.err (!%p1114_p1)
}
  0x86   : > { %p1635_p12 = scmp.ne.s32.totalorder %s1628_s24, 0  ;;  %p1636_p10 = scmp.ne.s32.totalorder %s1633_s9, 0 }
  0x87   : > { %s1479_s19 = sand.u32 (!%p1636_p10), 1, %s1192_s28   ;;  %p1637_p4 = scmp.ne.s32.totalorder (!%p1636_p10), %s1622_s17, 0 }
  0x88   : > { %928 = dma.hbm_to_vmem [thread:$0]  (!%p1635_p12), %s1455_s20, 128, %s394_s26, %s382_s13  }
  0x89   : > { %402 = sbr.rel (%p1636_p10) target bundleno = 524 (0x20c), region = 52  ;;  %s1482_s8 = sshll.u32 (!%p1636_p10), %s1479_s19, 3 }
  0x8a   : > { %s405_s27 = scalar_lea.sflag (!%p1636_p10), [#allocation3], %s1479_s19  ;;  %s408_s18 = scalar_lea.vmem (!%p1636_p10), [#allocation2], %s1482_s8 }
  0x90   : > { %1171 = dma.done.wait (%p1637_p4), %s405_s27, 128  }
  0x91   : > { %1173 = vsyncadd (%p1637_p4), %s405_s27, 4294967168  ;;  %s413_s24 = sand.u32 1, %s1293_s11   ;;  %s417_s20 = scalar_lea.vmem [#allocation5], %s1482_s8 }
  0x92   : > { %s414_s9 = scalar_lea.sflag [#allocation6], %s413_s24 }
  0x93   : > { %1175 = dma.done.wait (%p1637_p4), %s414_s9, 256  }
  0x94   : > { %1177 = vsyncadd (%p1637_p4), %s414_s9, 4294967040  ;;  %s426_s16 = scalar_lea.vmem [#allocation7], %s1482_s8  ;;  %s432_s26 = scalar_lea.sflag [#allocation9], %s1479_s19 }
  0x95   : > { %s435_s13 = scalar_lea.vmem [#allocation8], %s1482_s8 }
  0x96   : > { %1179 = dma.done.wait (%p1637_p4), %s432_s26, 128  }
  0x97   : > { %1181 = vsyncadd (%p1637_p4), %s432_s26, 4294967168  ;;  %v1214_v0 = vmov 0   ;;  %v522_v1 = vld [vmem:[%s1597_s6] sm:$0xff]  ;;  %p496_p7 = scmp.lt.s32.totalorder %s1200_s30, 1  ;;  %v512_v6 = vld [vmem:[%s417_s20] sm:$0xff]  ;;  %vm578_vm0 = vcmask 130048   ;;  %v525_v33 = vlaneseq }
  0x98   : > { %985 = vset.pattern.permute.xlu0 %v1214_v0  ;;  %v523_v2 = vld [vmem:[%s1598_s7] sm:$0xff]  ;;  %v569_v9 = vand.u32 2147483647, %v512_v6  ;;  %v515_v28 = vld [vmem:[%s435_s13] sm:$0xff]  ;;  %v566_v43 = vmax.f32 %v512_v6, 0.0  ;;  %v1215_v56 = vmov 0.0  }
  0x99   : > { %545 = vperm.xlu0 %985, %v522_v1   ;;  %s1511_s29 = scalar_select %p496_p7, %s1200_s30, 1  ;;  %v511_v5 = vld [vmem:[%s408_s18] sm:$0xff]  ;;  %v520_v31 = vmul.f32 0.9, %v515_v28  ;;  %v1523_v40 = vand.u32 127, %v525_v33  ;;  %vm645_vm3 = vcmask 122880  }
  0x9a   : > { %v552_v7 = vand.u32 2147483647, %v511_v5  ;;  %v513_v11 = vld [vmem:[%s426_s16] sm:$0xff]  ;;  %v570_v13 = vsub.f32 0.0, %v569_v9  ;;  %v549_v41 = vmax.f32 %v511_v5, 0.0  ;;  %s1638_s20 = sld [smem:[#allocation20_spill]] }
  0x9b   : > { %s887_s17 = sshll.u32 %s1511_s29, 3  ;;  %v516_v14 = vmul.f32 0.9, %v513_v11  ;;  %v521_v35 = vadd.f32 0.05, %v520_v31  ;;  %vm529_vm1 = vcmp.lt.s32.totalorder %v1523_v40, 16 }
  0x9c   : > { %s502_s21 = scalar_lea.vmem %s1591_s0, %s887_s17  ;;  %v553_v10 = vsub.f32 0.0, %v552_v7  ;;  %v571_v16 = vmul.f32 1.442695, %v570_v13  ;;  %s509_s12 = scalar_lea.vmem %s1595_s4, %s887_s17  ;;  %v889_v57 = vsel %vm529_vm1, 1.0, %v1215_v56  ;;  %vm656_vm4 = vcmp.eq.s32.totalorder %v1523_v40, 0 }
  0x9d   : > { %562 = vperm.xlu0 %985, %v523_v2   ;;  %v510_v3 = vld [vmem:[%s502_s21] sm:$0xff]  ;;  %v517_v17 = vadd.f32 0.05, %v516_v14  ;;  %v567_v44 = vmul.f32 %v521_v35, %v512_v6  ;;  %vm659_vm5 = vcmp.eq.s32.totalorder %v1523_v40, 1  ;;  %vm663_vm6 = vcmp.eq.s32.totalorder %v1523_v40, 2  ;;  %s891_s16 = sshll.u32 %s1200_s30, 4 }
  0x9e   : > { %v535_v4 = vand.u32 2147483647, %v510_v3  ;;  %v554_v15 = vmul.f32 1.442695, %v553_v10  ;;  %v514_v27 = vld [vmem:[%s509_s12] sm:$0xff]  ;;  %v532_v36 = vmax.f32 %v510_v3, 0.0 }
  0x9f   : > { %v579_v18 = vsel %vm578_vm0, %v517_v17, 0.0  ;;  %v518_v30 = vmul.f32 0.9, %v514_v27  ;;  %v533_v37 = vmul.f32 %v517_v17, %v510_v3  ;;  %v568_v51 = vsub.f32 %v566_v43, %v567_v44  ;;  %s495_s13 = scalar_lea.vmem [#allocation10], %s1479_s19  ;;  %s1639_s15 = sld [smem:[#allocation24_spill]] }
  0xa0   : > { %v536_v8 = vsub.f32 0.0, %v535_v4  ;;  %v580_v20 = vrot.slane %v579_v18, 4  ;;  %vm667_vm7 = vcmp.eq.s32.totalorder %v1523_v40, 3  ;;  %vm671_vm8 = vcmp.eq.s32.totalorder %v1523_v40, 4  ;;  %s695_s11 = sshll.u32 %s495_s13, 4  ;;  %s682_s30 = scalar_lea.sflag [#allocation4], %s1479_s19  ;;  %s1544_s11 = int_to_ptr.vmem [resolvable:$true] %s695_s11 }
  0xa1   : > { %v519_v34 = vadd.f32 0.05, %v518_v30  ;;  %v534_v46 = vsub.f32 %v532_v36, %v533_v37  ;;  %vm675_vm9 = vcmp.eq.s32.totalorder %v1523_v40, 5  ;;  %vm679_vm10 = vcmask 57344   ;;  %s1118_s17 = scalar_lea.vmem %s1544_s11, 16  ;;  %p1640_p9 = scmp.ne.s32.totalorder %s1638_s20, 0 }
  0xa2   : > { %v537_v12 = vmul.f32 1.442695, %v536_v8  ;;  %v581_v24 = vadd.f32 %v580_v20, %v579_v18  ;;  %p1119_p8 = scmp.ne.s32.totalorder %s1544_s11, %s1118_s17  ;;  %s1216_s10 = smov [#allocation10]  }
  0xa3   : > { %v550_v42 = vmul.f32 %v519_v34, %v511_v5  ;;  %s1122_s23 = sshll.u32 %s1216_s10, 4  ;;  %s1123_s23 = int_to_ptr.vmem [resolvable:$false] %s1122_s23 }
  0xa4   : > { %986 = vpow2.f32 %v537_v12  ;;  %v582_v29 = vrot.slane %v581_v24, 2  ;;  %p1120_p6 = pnand %p1119_p8, %p1640_p9  ;;  %s1124_s21 = scalar_lea.vmem %s1123_s23, 32 }
  0xa5   : > { %988 = vpow2.f32 %v554_v15  ;;  %v551_v50 = vsub.f32 %v549_v41, %v550_v42  ;;  %s1542_s29 = scalar_lea.hbm %s1639_s15, %s891_s16  ;;  %p1125_p11 = scmp.lt.s32.totalorder %s1544_s11, %s1123_s23 }
  0xa6   : > { %990 = vpow2.f32 %v571_v16  ;;  %v583_v32 = vadd.f32 %v582_v29, %v581_v24  ;;  %p1121_p13 = pneg %p1120_p6  ;;  %p1126_p2 = scmp.lt.s32.totalorder %s1124_s21, %s1118_s17 }
  0xa8   : > { %v584_v38 = vrot.slane %v583_v32, 1  ;;  %p1127_p5 = por %p1126_p2, %p1125_p11 }
  0xaa   : > { %v585_v48 = vadd.f32 %v584_v38, %v583_v32  ;;  %p1128_p0 = pnand %p1127_p5, %p1121_p13 }
  0xac   : > { %vm586_vm2 = vcmp.gt.f32.partialorder %v585_v48, 0.0 }
  0xad   : > { %v890_v58 = vsel %vm586_vm2, 1.0, %v1215_v56 }
  0xae   : > { %v987_v19 = vpop.eup %986  ;;  %v589_v63 = vmul.f32 %v890_v58, %v889_v57 }
  0xaf   : > { %v989_v21 = vpop.eup %988  ;;  %v539_v22 = vadd.f32 1.0, %v987_v19 }
  0xb0   : > { %v991_v23 = vpop.eup %990  ;;  %v556_v25 = vadd.f32 1.0, %v989_v21  ;;  %v646_v12 = vsel %vm645_vm3, %v589_v63, 0.0 }
  0xb1   : > { %992 = vlog2.f32 %v539_v22  ;;  %v573_v26 = vadd.f32 1.0, %v991_v23 }
  0xb2   : > { %994 = vlog2.f32 %v556_v25 }
  0xb3   : > { %996 = vlog2.f32 %v573_v26 }
  0xbb   : > { %v993_v39 = vpop.eup %992 }
  0xbc   : > { %v995_v45 = vpop.eup %994  ;;  %v541_v47 = vmul.f32 0.6931472, %v993_v39 }
  0xbd   : > { %v997_v49 = vpop.eup %996  ;;  %v558_v53 = vmul.f32 0.6931472, %v995_v45 }
  0xbe   : > { %v542_v52 = vadd.f32 %v541_v47, %v534_v46  ;;  %v575_v54 = vmul.f32 0.6931472, %v997_v49 }
  0xbf   : > { %v559_v60 = vadd.f32 %v558_v53, %v551_v50 }
  0xc0   : > { %v576_v61 = vadd.f32 %v575_v54, %v568_v51 }
 0x118   : > { %v546_v55 = vpop.permute.xlu0 %545 }
 0x119   : > { %v548_v59 = vmul.f32 %v546_v55, %v542_v52 }
 0x11b   : > { %v590_v62 = vmul.f32 %v889_v57, %v548_v59 }
 0x11c   : > { %v563_v0 = vpop.permute.xlu0 %562 }
 0x11d   : > { %v565_v1 = vmul.f32 %v563_v0, %v559_v60  ;;  %v577_v2 = vmul.f32 %v576_v61, %v563_v0  ;;  %v591_v3 = vsel %vm578_vm0, %v590_v62, 0.0 }
 0x11e   : > { %592 = vadd.xlane.f32.xlu1 %v591_v3 }
 0x11f   : > { %v612_v4 = vmul.f32 %v589_v63, %v577_v2  ;;  %v601_v5 = vmul.f32 %v589_v63, %v565_v1  ;;  %v623_v8 = vmul.f32 %v889_v57, %v565_v1  ;;  %v634_v10 = vmul.f32 %v889_v57, %v577_v2 }
 0x121   : > { %v613_v6 = vsel %vm578_vm0, %v612_v4, 0.0  ;;  %v602_v7 = vsel %vm578_vm0, %v601_v5, 0.0  ;;  %v624_v9 = vsel %vm578_vm0, %v623_v8, 0.0  ;;  %v635_v11 = vsel %vm578_vm0, %v634_v10, 0.0 }
 0x122   : > { %614 = vadd.xlane.f32.xlu0 %v613_v6  ;;  %603 = vadd.xlane.f32.xlu1 %v602_v7 }
 0x126   : > { %625 = vadd.xlane.f32.xlu1 %v624_v9 }
 0x12a   : > { %636 = vadd.xlane.f32.xlu1 %v635_v11 }
 0x12e   : > { %647 = vadd.xlane.f32.xlu1 %v646_v12 }
 0x1ab   : > { %v593_v13 = vpop.xlane.xlu1 %592 }
 0x1ac   : > { %v594_v14 = vrot.slane %v593_v13, 4 }
 0x1ae   : > { %v595_v15 = vadd.f32 %v594_v14, %v593_v13 }
 0x1af   : > { %v615_v16 = vpop.xlane.xlu0 %614  ;;  %v604_v17 = vpop.xlane.xlu1 %603 }
 0x1b0   : > { %v596_v18 = vrot.slane %v595_v15, 2  ;;  %v616_v19 = vrot.slane %v615_v16, 4  ;;  %v605_v20 = vrot.slane %v604_v17, 4 }
 0x1b2   : > { %v617_v21 = vadd.f32 %v616_v19, %v615_v16  ;;  %v606_v22 = vadd.f32 %v605_v20, %v604_v17  ;;  %v597_v23 = vadd.f32 %v596_v18, %v595_v15 }
 0x1b3   : > { %v626_v24 = vpop.xlane.xlu1 %625 }
 0x1b4   : > { %v618_v25 = vrot.slane %v617_v21, 2  ;;  %v607_v26 = vrot.slane %v606_v22, 2  ;;  %v627_v27 = vrot.slane %v626_v24, 4  ;;  %v598_v28 = vrot.slane %v597_v23, 1 }
 0x1b6   : > { %v619_v29 = vadd.f32 %v618_v25, %v617_v21  ;;  %v628_v30 = vadd.f32 %v627_v27, %v626_v24  ;;  %v599_v31 = vadd.f32 %v598_v28, %v597_v23  ;;  %v608_v32 = vadd.f32 %v607_v26, %v606_v22 }
 0x1b7   : > { %v637_v33 = vpop.xlane.xlu1 %636 }
 0x1b8   : > { %v629_v34 = vrot.slane %v628_v30, 2  ;;  %v638_v35 = vrot.slane %v637_v33, 4  ;;  %894 = vpush %v599_v31  ;;  %v609_v36 = vrot.slane %v608_v32, 1  ;;  %v620_v37 = vrot.slane %v619_v29, 1 }
 0x1ba   : > { %v639_v38 = vadd.f32 %v638_v35, %v637_v33  ;;  %v610_v39 = vadd.f32 %v609_v36, %v608_v32  ;;  %v621_v41 = vadd.f32 %v620_v37, %v619_v29  ;;  %v630_v42 = vadd.f32 %v629_v34, %v628_v30 }
 0x1bb   : > { %v648_v43 = vpop.xlane.xlu1 %647 }
 0x1bc   : > { %v640_v44 = vrot.slane %v639_v38, 2  ;;  %v649_v45 = vrot.slane %v648_v43, 4  ;;  %896 = vpush %v610_v39  ;;  %v631_v46 = vrot.slane %v630_v42, 1 }
 0x1bd   : > { %898 = vpush %v621_v41 }
 0x1be   : > { %v650_v47 = vadd.f32 %v649_v45, %v648_v43  ;;  %v632_v48 = vadd.f32 %v631_v46, %v630_v42  ;;  %v641_v49 = vadd.f32 %v640_v44, %v639_v38 }
 0x1c0   : > { %v651_v50 = vrot.slane %v650_v47, 2  ;;  %900 = vpush %v632_v48  ;;  %v642_v51 = vrot.slane %v641_v49, 1 }
 0x1c2   : > { %v652_v52 = vadd.f32 %v651_v50, %v650_v47  ;;  %v643_v53 = vadd.f32 %v642_v51, %v641_v49 }
 0x1c4   : > { %902 = vpush %v643_v53  ;;  %v653_v54 = vrot.slane %v652_v52, 1 }
 0x1c6   : > { %v654_v55 = vadd.f32 %v653_v54, %v652_v52 }
 0x1c8   : > { %904 = vpush %v654_v55 }
 0x1e9   : > { %s895_s8 = spop %894 }
 0x1ea   : > { %v657_v56 = vstv %s895_s8 }
 0x1eb   : > { %v658_v58 = vsel %vm656_vm4, %v657_v56, 0.0 }
 0x1ed   : > { %s897_s27 = spop %896 }
 0x1ee   : > { %v660_v57 = vstv %s897_s27  ;;  %s899_s18 = spop %898 }
 0x1ef   : > { %v661_v59 = vsel %vm659_vm5, %v660_v57, 0.0  ;;  %v664_v61 = vstv %s899_s18 }
 0x1f0   : > { %v662_v60 = vadd.f32 %v661_v59, %v658_v58  ;;  %v665_v63 = vsel %vm663_vm6, %v664_v61, 0.0 }
 0x1f1   : > { %s901_s24 = spop %900 }
 0x1f2   : > { %v668_v62 = vstv %s901_s24  ;;  %v666_v0 = vadd.f32 %v665_v63, %v662_v60 }
 0x1f3   : > { %v669_v1 = vsel %vm667_vm7, %v668_v62, 0.0 }
 0x1f4   : > { %v670_v4 = vadd.f32 %v669_v1, %v666_v0 }
 0x1f5   : > { %s903_s9 = spop %902 }
 0x1f6   : > { %v672_v2 = vstv %s903_s9 }
 0x1f7   : > { %v673_v3 = vsel %vm671_vm8, %v672_v2, 0.0 }
 0x1f8   : > { %v674_v5 = vadd.f32 %v673_v3, %v670_v4 }
 0x1f9   : > { %s905_s26 = spop %904 }
 0x1fa   : > { %v676_v6 = vstv %s905_s26 }
 0x1fb   : > { %v677_v7 = vsel %vm675_vm9, %v676_v6, 0.0 }
 0x1fc   : > { %v678_v8 = vadd.f32 %v677_v7, %v674_v5 }
 0x1fe   : > { %680 = vst.msk [vmem:[%s495_s13] sm:$0x1] %vm679_vm10, %v678_v8 }
 0x1ff   : > { %1131 = shalt.err (!%p1128_p0)
}
 0x200   : > { %s1132_s19 = scalar_lea.hbm %s1542_s29, 16  ;;  %s1136_s12 = scalar_lea.hbm %s1639_s15, 32 }
 0x201   : > { %p1133_p3 = scmp.ne.s32.totalorder %s1542_s29, %s1132_s19  ;;  %p1137_p10 = scmp.lt.u32.totalorder %s1542_s29, %s1639_s15 }
 0x202   : > { %p1138_p4 = scmp.lt.u32.totalorder %s1136_s12, %s1132_s19  ;;  %p1140_p8 = scmp.lt.u32.totalorder %s1132_s19, %s1542_s29 }
 0x203   : > { %p1134_p1 = pnand %p1133_p3, %p1640_p9 }
 0x204   : > { %p1139_p7 = por %p1138_p4, %p1137_p10 }
 0x205   : > { %p1135_p12 = pneg %p1134_p1 }
 0x206   : > { %p1141_p6 = por %p1140_p8, %p1139_p7 }
 0x208   : > { %p1142_p13 = pnand %p1141_p6, %p1135_p12 }
 0x20a   : > { %1145 = shalt.err (!%p1142_p13)
}
 0x20b   : > { %914 = dma.vmem_to_hbm [thread:$0]  (%p1640_p9), %s1544_s11, 16, %s1542_s29, %s682_s30  }
 0x20c PF: > { %s1641_s18 = sld [smem:[#allocation15_spill]]  ;;  %s1642_s24 = sld [smem:[#allocation22_spill]] }
 0x20d   : > { %s1643_s9 = sld [smem:[#allocation18_spill]] }
 0x212   : > { %s707_s16 = sand.u32 1, %s1641_s18   ;;  %p1644_p11 = scmp.ne.s32.totalorder %s1642_s24, 0 }
 0x213   : > { %p1645_p2 = scmp.ge.s32.totalorder %s1643_s9, 2  ;;  %s708_s26 = scalar_lea.sflag [#allocation4], %s707_s16 }
 0x215   : > { %p930_p5 = pnand %p1645_p2, %p1644_p11 }
 0x217   : > { %1183 = dma.done.wait (!%p930_p5), %s708_s26, 16  }
 0x218   : > { %1185 = vsyncadd (!%p930_p5), %s708_s26, 4294967280  ;;  %s30_s10 = sadd.s32 1, %s1643_s9   ;;  %s1646_s13 = sld [smem:[#allocation16_spill]] }
 0x219   : > { %p27_p0 = scmp.ge.s32.totalorder %s30_s10, 4   ;;  %s1647_s29 = sld [smem:[#allocation21_spill]] }
 0x21a   : > { %s1648_s30 = sld [smem:[#allocation17_spill]]  ;;  %s1649_s9 = sld [smem:[#allocation19_spill]] }
 0x21b   : > { %s1650_s27 = smov %s1192_s28  ;;  %29 = sbr.rel (!%p27_p0) target bundleno = 13 (0xd), region = 140 }
 0x21e   : > { %s1651_s28 = smov %s1646_s13 }
 0x222   :  { %712 = vsyncpa [#allocation3], 1 }
 0x223   :  { %714 = vsyncpa [#allocation3 + $0x1], 1 }
 0x224   :  { %715 = vsyncpa [#allocation6], 1 }
 0x225   :  { %717 = vsyncpa [#allocation6 + $0x1], 1 }
 0x226   :  { %718 = vsyncpa [#allocation9], 1 }
 0x227   :  { %720 = vsyncpa [#allocation9 + $0x1], 1 }
 0x228   :  { %721 = vsyncpa [#allocation4], 1 }
 0x229   :  { %723 = vsyncpa [#allocation4 + $0x1], 1 }

</bundles_post_ra>
